<compile_context>
chip_gen: v7x
topology: tpu7x:2x2x1
jax: 0.10.0
libtpu: 0.0.40
codegen_flags: <defaults>
</compile_context>

<pallas_src>
import jax
import jax.numpy as jnp
import numpy as np
from jax.experimental import pallas as pl
from jax.experimental.pallas import tpu as pltpu


def ffn_kernel(xT_ref, b2piT_ref, w0T_ref, b0_ref, wsT_ref, bs_ref,
               wLT_ref, bL_ref, oT_ref):
    """All activations are [channels, tile_n] (channel-sublane, point-lane)."""
    xT = xT_ref[...]                                              # [Cin, tn] f32

    # Gaussian Fourier-feature embedding.  2*pi already folded into B.
    # Keep this matmul in f32: phases are large and feed sin/cos directly.
    proj = jnp.dot(b2piT_ref[...], xT,
                   preferred_element_type=jnp.float32)            # [M, tn]
    h = jnp.concatenate([jnp.sin(proj), jnp.cos(proj)], axis=0)   # [2M, tn]

    # First hidden layer (embed_dim -> interm): bf16 operands, f32 accumulate.
    h = jnp.dot(w0T_ref[...], h.astype(jnp.bfloat16),
                preferred_element_type=jnp.float32) + b0_ref[...]
    h = jnp.maximum(h, 0.0)

    # Remaining hidden layers, stacked weights [L-1, interm, interm].
    for l in range(wsT_ref.shape[0]):                             # static unroll
        h = jnp.dot(wsT_ref[l], h.astype(jnp.bfloat16),
                    preferred_element_type=jnp.float32) + bs_ref[l]
        h = jnp.maximum(h, 0.0)

    # Output linear + sin (output_linear=False).
    h = jnp.dot(wLT_ref[...], h.astype(jnp.bfloat16),
                preferred_element_type=jnp.float32) + bL_ref[...]
    oT_ref[...] = jnp.sin(h).astype(oT_ref.dtype)                 # [out_c, tn]


def _choose_tile(n, requested):
    """Lane-aligned row tile: as large as requested, but keep >=2 grid steps
    when possible so v7x can split the 'parallel' axis over both TensorCores.
    VMEM is never the constraint here (all weights together are ~10 KB)."""
    requested = max(128, (requested // 128) * 128)
    half = 128 * pl.cdiv(n, 2 * 128)          # ~ceil(n/2), rounded up to lanes
    return max(128, min(requested, half))


def ffn_pallas(x, b_mat, weights, biases, *, tile_n=4096):
    """x: [N, Cin]; b_mat: [Cin, M]; weights[i]: [d_in, d_out]; biases[i]: [d_out]."""
    assert len(weights) >= 3, "expects >=2 hidden linears + output linear"
    N, c_in = x.shape
    interm = weights[0].shape[1]
    out_c = weights[-1].shape[1]

    tile = _choose_tile(N, tile_n)
    n_pad = pl.cdiv(N, tile) * tile
    grid = (n_pad // tile,)

    # Transposed / padded operands (point dim -> lanes).  Padded tail rows are
    # computed but sliced off before returning.
    xT = jnp.pad(x.astype(jnp.float32), ((0, n_pad - N), (0, 0))).T     # [Cin, n_pad]
    b2piT = (2.0 * np.pi) * b_mat.astype(jnp.float32).T                 # [M, Cin]
    w0T = weights[0].T.astype(jnp.bfloat16)                             # [interm, 2M]
    b0 = biases[0].reshape(interm, 1).astype(jnp.float32)
    wsT = jnp.stack([w.T for w in weights[1:-1]]).astype(jnp.bfloat16)  # [L-1, interm, interm]
    bs = jnp.stack([b.reshape(interm, 1) for b in biases[1:-1]]).astype(jnp.float32)
    wLT = weights[-1].T.astype(jnp.bfloat16)                            # [out_c, interm]
    bL = biases[-1].reshape(out_c, 1).astype(jnp.float32)

    in_specs = [
        pl.BlockSpec((c_in, tile), lambda i: (0, i)),    # x tile (lane-major)
        pl.BlockSpec(b2piT.shape, lambda i: (0, 0)),     # fixed params: whole
        pl.BlockSpec(w0T.shape, lambda i: (0, 0)),       # array, same block
        pl.BlockSpec(b0.shape, lambda i: (0, 0)),        # every grid step
        pl.BlockSpec(wsT.shape, lambda i: (0, 0, 0)),
        pl.BlockSpec(bs.shape, lambda i: (0, 0, 0)),
        pl.BlockSpec(wLT.shape, lambda i: (0, 0)),
        pl.BlockSpec(bL.shape, lambda i: (0, 0)),
    ]

    outT = pl.pallas_call(
        ffn_kernel,
        out_shape=jax.ShapeDtypeStruct((out_c, n_pad), jnp.float32),
        grid=grid,
        in_specs=in_specs,
        out_specs=pl.BlockSpec((out_c, tile), lambda i: (0, i)),  # lane-dense store
        compiler_params=pltpu.CompilerParams(
            dimension_semantics=("parallel",)),
    )(xT, b2piT, w0T, b0, wsT, bs, wLT, bL)

    return outT.T[:N]                                             # [N, out_c]


def ffn_reference(x, b_mat, weights, biases, matmul_dtype=jnp.float32):
    """Pure-JAX module semantics.  matmul_dtype=bfloat16 mirrors the kernel's
    MXU operand precision (accumulation stays f32 in both)."""
    proj = 2.0 * np.pi * (x @ b_mat)
    h = jnp.concatenate([jnp.sin(proj), jnp.cos(proj)], axis=-1)
    for w, b in zip(weights[:-1], biases[:-1]):
        z = jnp.dot(h.astype(matmul_dtype), w.astype(matmul_dtype),
                    preferred_element_type=jnp.float32) + b
        h = jax.nn.relu(z)
    z = jnp.dot(h.astype(matmul_dtype), weights[-1].astype(matmul_dtype),
                preferred_element_type=jnp.float32) + biases[-1]
    return jnp.sin(z)


if __name__ == "__main__":
    # Small shapes consistent with the module's forward.
    N = 256            # number of input points (rows)
    in_channels = 2
    mapping_size = 16  # GaussianFFNEmbedder.out_channels = 2 * mapping_size = 32
    ff_scale = 10.0
    interm_channels = 32
    out_channels = 3
    n_layers = 4       # -> n_layers + 1 = 5 linear maps total

    key = jax.random.PRNGKey(0)
    keys = jax.random.split(key, 2 + 2 * (n_layers + 1))

    x = jax.random.normal(keys[0], (N, in_channels), dtype=jnp.float32)

    # Gaussian random projection matrix of the FFN embedder (fixed, not trained).
    b_mat = ff_scale * jax.random.normal(keys[1], (in_channels, mapping_size),
                                         dtype=jnp.float32)

    # Linear layer params (deterministic synthetic init, PyTorch-style fan-in bound).
    embed_dim = 2 * mapping_size
    dims = [embed_dim] + [interm_channels] * n_layers + [out_channels]
    weights, biases = [], []
    for li, (d_in, d_out) in enumerate(zip(dims[:-1], dims[1:])):
        bound = 1.0 / np.sqrt(d_in)
        w = jax.random.uniform(keys[2 + 2 * li], (d_in, d_out),
                               minval=-bound, maxval=bound, dtype=jnp.float32)
        b = jax.random.uniform(keys[3 + 2 * li], (d_out,),
                               minval=-bound, maxval=bound, dtype=jnp.float32)
        weights.append(w)
        biases.append(b)

    out = jax.block_until_ready(ffn_pallas(x, b_mat, weights, biases))

    # Compare against a reference using the same matmul operand precision as
    # the kernel (bf16 operands, f32 accumulation) -- the only deviation from
    # pure-f32 module math is that operand rounding.
    ref = ffn_reference(x, b_mat, weights, biases, matmul_dtype=jnp.bfloat16)
    np.testing.assert_allclose(np.asarray(out), np.asarray(ref),
                               rtol=1e-2, atol=1e-2)

    # TODO(synk): GaussianFFNEmbedder source not provided; implemented the standard
    # Gaussian Fourier-feature embedding [sin(2*pi*xB), cos(2*pi*xB)] with fixed B.
    print("KERNEL_OK")
</pallas_src>

<mosaic_0001>
module attributes {stable_mosaic.version = 11 : i64} {
  func.func @ffn_kernel(%arg0: i32, %arg1: memref<2x128xf32, #tpu.memory_space<vmem>>, %arg2: memref<16x2xf32, #tpu.memory_space<vmem>>, %arg3: memref<32x32xbf16, #tpu.memory_space<vmem>>, %arg4: memref<32x1xf32, #tpu.memory_space<vmem>>, %arg5: memref<3x32x32xbf16, #tpu.memory_space<vmem>>, %arg6: memref<3x32x1xf32, #tpu.memory_space<vmem>>, %arg7: memref<3x32xbf16, #tpu.memory_space<vmem>>, %arg8: memref<3x1xf32, #tpu.memory_space<vmem>>, %arg9: memref<3x128xf32, #tpu.memory_space<vmem>>) attributes {dimension_semantics = [#tpu.dimension_semantics<parallel>], iteration_bounds = array<i64: 2>, scalar_prefetch = 0 : i64, scratch_operands = 0 : i64, tpu.core_type = #tpu.core_type<tc>, window_params = [{transform_indices = @transform_0, window_bounds = array<i64: 2, 128>}, {pipeline_mode = #tpu.pipeline_mode<synchronous>, transform_indices = @transform_1, window_bounds = array<i64: 16, 2>}, {pipeline_mode = #tpu.pipeline_mode<synchronous>, transform_indices = @transform_2, window_bounds = array<i64: 32, 32>}, {pipeline_mode = #tpu.pipeline_mode<synchronous>, transform_indices = @transform_3, window_bounds = array<i64: 32, 1>}, {pipeline_mode = #tpu.pipeline_mode<synchronous>, transform_indices = @transform_4, window_bounds = array<i64: 3, 32, 32>}, {pipeline_mode = #tpu.pipeline_mode<synchronous>, transform_indices = @transform_5, window_bounds = array<i64: 3, 32, 1>}, {pipeline_mode = #tpu.pipeline_mode<synchronous>, transform_indices = @transform_6, window_bounds = array<i64: 3, 32>}, {pipeline_mode = #tpu.pipeline_mode<synchronous>, transform_indices = @transform_7, window_bounds = array<i64: 3, 1>}, {transform_indices = @transform_8, window_bounds = array<i64: 3, 128>}]} {
    %c0 = arith.constant 0 : index
    %c0_0 = arith.constant 0 : index
    %0 = vector.load %arg1[%c0, %c0_0] : memref<2x128xf32, #tpu.memory_space<vmem>>, vector<2x128xf32>
    %c0_1 = arith.constant 0 : index
    %c0_2 = arith.constant 0 : index
    %1 = vector.load %arg2[%c0_1, %c0_2] : memref<16x2xf32, #tpu.memory_space<vmem>>, vector<16x2xf32>
    %cst = arith.constant dense<0.000000e+00> : vector<16x128xf32>
    %2 = tpu.matmul %1, %0, %cst {dimension_numbers = #tpu.dot_dimension_numbers<[1], [0], [0], [1], [0, 0, 1, 1], [], []>} : vector<16x2xf32>, vector<2x128xf32>, vector<16x128xf32> -> vector<16x128xf32>
    %3 = math.sin %2 : vector<16x128xf32>
    %4 = math.cos %2 : vector<16x128xf32>
    %5 = tpu.concatenate %3, %4 in 0 : vector<16x128xf32>, vector<16x128xf32> -> vector<32x128xf32>
    %c0_3 = arith.constant 0 : index
    %c0_4 = arith.constant 0 : index
    %6 = vector.load %arg3[%c0_3, %c0_4] : memref<32x32xbf16, #tpu.memory_space<vmem>>, vector<32x32xbf16>
    %7 = arith.truncf %5 : vector<32x128xf32> to vector<32x128xbf16>
    %cst_5 = arith.constant dense<0.000000e+00> : vector<32x128xf32>
    %8 = tpu.matmul %6, %7, %cst_5 {dimension_numbers = #tpu.dot_dimension_numbers<[1], [0], [0], [1], [0, 0, 1, 1], [], []>} : vector<32x32xbf16>, vector<32x128xbf16>, vector<32x128xf32> -> vector<32x128xf32>
    %c0_6 = arith.constant 0 : index
    %c0_7 = arith.constant 0 : index
    %9 = vector.load %arg4[%c0_6, %c0_7] : memref<32x1xf32, #tpu.memory_space<vmem>>, vector<32x1xf32>
    %10 = vector.broadcast %9 : vector<32x1xf32> to vector<32x128xf32>
    %11 = arith.addf %8, %10 : vector<32x128xf32>
    %cst_8 = arith.constant 0.000000e+00 : f32
    %12 = vector.broadcast %cst_8 : f32 to vector<32x128xf32>
    %13 = arith.maximumf %11, %12 : vector<32x128xf32>
    %c0_9 = arith.constant 0 : index
    %c0_10 = arith.constant 0 : index
    %c0_11 = arith.constant 0 : index
    %14 = vector.load %arg5[%c0_9, %c0_10, %c0_11] : memref<3x32x32xbf16, #tpu.memory_space<vmem>>, vector<1x32x32xbf16>
    %15 = vector.shape_cast %14 : vector<1x32x32xbf16> to vector<32x32xbf16>
    %16 = arith.truncf %13 : vector<32x128xf32> to vector<32x128xbf16>
    %cst_12 = arith.constant dense<0.000000e+00> : vector<32x128xf32>
    %17 = tpu.matmul %15, %16, %cst_12 {dimension_numbers = #tpu.dot_dimension_numbers<[1], [0], [0], [1], [0, 0, 1, 1], [], []>} : vector<32x32xbf16>, vector<32x128xbf16>, vector<32x128xf32> -> vector<32x128xf32>
    %c0_13 = arith.constant 0 : index
    %c0_14 = arith.constant 0 : index
    %c0_15 = arith.constant 0 : index
    %18 = vector.load %arg6[%c0_13, %c0_14, %c0_15] : memref<3x32x1xf32, #tpu.memory_space<vmem>>, vector<1x32x1xf32>
    %19 = vector.shape_cast %18 : vector<1x32x1xf32> to vector<32x1xf32>
    %20 = vector.broadcast %19 : vector<32x1xf32> to vector<32x128xf32>
    %21 = arith.addf %17, %20 : vector<32x128xf32>
    %cst_16 = arith.constant 0.000000e+00 : f32
    %22 = vector.broadcast %cst_16 : f32 to vector<32x128xf32>
    %23 = arith.maximumf %21, %22 : vector<32x128xf32>
    %c1 = arith.constant 1 : index
    %c0_17 = arith.constant 0 : index
    %c0_18 = arith.constant 0 : index
    %24 = vector.load %arg5[%c1, %c0_17, %c0_18] : memref<3x32x32xbf16, #tpu.memory_space<vmem>>, vector<1x32x32xbf16>
    %25 = vector.shape_cast %24 : vector<1x32x32xbf16> to vector<32x32xbf16>
    %26 = arith.truncf %23 : vector<32x128xf32> to vector<32x128xbf16>
    %cst_19 = arith.constant dense<0.000000e+00> : vector<32x128xf32>
    %27 = tpu.matmul %25, %26, %cst_19 {dimension_numbers = #tpu.dot_dimension_numbers<[1], [0], [0], [1], [0, 0, 1, 1], [], []>} : vector<32x32xbf16>, vector<32x128xbf16>, vector<32x128xf32> -> vector<32x128xf32>
    %c1_20 = arith.constant 1 : index
    %c0_21 = arith.constant 0 : index
    %c0_22 = arith.constant 0 : index
    %28 = vector.load %arg6[%c1_20, %c0_21, %c0_22] : memref<3x32x1xf32, #tpu.memory_space<vmem>>, vector<1x32x1xf32>
    %29 = vector.shape_cast %28 : vector<1x32x1xf32> to vector<32x1xf32>
    %30 = vector.broadcast %29 : vector<32x1xf32> to vector<32x128xf32>
    %31 = arith.addf %27, %30 : vector<32x128xf32>
    %cst_23 = arith.constant 0.000000e+00 : f32
    %32 = vector.broadcast %cst_23 : f32 to vector<32x128xf32>
    %33 = arith.maximumf %31, %32 : vector<32x128xf32>
    %c2 = arith.constant 2 : index
    %c0_24 = arith.constant 0 : index
    %c0_25 = arith.constant 0 : index
    %34 = vector.load %arg5[%c2, %c0_24, %c0_25] : memref<3x32x32xbf16, #tpu.memory_space<vmem>>, vector<1x32x32xbf16>
    %35 = vector.shape_cast %34 : vector<1x32x32xbf16> to vector<32x32xbf16>
    %36 = arith.truncf %33 : vector<32x128xf32> to vector<32x128xbf16>
    %cst_26 = arith.constant dense<0.000000e+00> : vector<32x128xf32>
    %37 = tpu.matmul %35, %36, %cst_26 {dimension_numbers = #tpu.dot_dimension_numbers<[1], [0], [0], [1], [0, 0, 1, 1], [], []>} : vector<32x32xbf16>, vector<32x128xbf16>, vector<32x128xf32> -> vector<32x128xf32>
    %c2_27 = arith.constant 2 : index
    %c0_28 = arith.constant 0 : index
    %c0_29 = arith.constant 0 : index
    %38 = vector.load %arg6[%c2_27, %c0_28, %c0_29] : memref<3x32x1xf32, #tpu.memory_space<vmem>>, vector<1x32x1xf32>
    %39 = vector.shape_cast %38 : vector<1x32x1xf32> to vector<32x1xf32>
    %40 = vector.broadcast %39 : vector<32x1xf32> to vector<32x128xf32>
    %41 = arith.addf %37, %40 : vector<32x128xf32>
    %cst_30 = arith.constant 0.000000e+00 : f32
    %42 = vector.broadcast %cst_30 : f32 to vector<32x128xf32>
    %43 = arith.maximumf %41, %42 : vector<32x128xf32>
    %c0_31 = arith.constant 0 : index
    %c0_32 = arith.constant 0 : index
    %44 = vector.load %arg7[%c0_31, %c0_32] : memref<3x32xbf16, #tpu.memory_space<vmem>>, vector<3x32xbf16>
    %45 = arith.truncf %43 : vector<32x128xf32> to vector<32x128xbf16>
    %cst_33 = arith.constant dense<0.000000e+00> : vector<3x128xf32>
    %46 = tpu.matmul %44, %45, %cst_33 {dimension_numbers = #tpu.dot_dimension_numbers<[1], [0], [0], [1], [0, 0, 1, 1], [], []>} : vector<3x32xbf16>, vector<32x128xbf16>, vector<3x128xf32> -> vector<3x128xf32>
    %c0_34 = arith.constant 0 : index
    %c0_35 = arith.constant 0 : index
    %47 = vector.load %arg8[%c0_34, %c0_35] : memref<3x1xf32, #tpu.memory_space<vmem>>, vector<3x1xf32>
    %48 = vector.broadcast %47 : vector<3x1xf32> to vector<3x128xf32>
    %49 = arith.addf %46, %48 : vector<3x128xf32>
    %50 = math.sin %49 : vector<3x128xf32>
    %c0_36 = arith.constant 0 : index
    %c0_37 = arith.constant 0 : index
    %51 = vector.load %arg9[%c0_36, %c0_37] : memref<3x128xf32, #tpu.memory_space<vmem>>, vector<3x128xf32>
    tpu.vector_store %arg9[%c0_36, %c0_37], %50 {strides = array<i32>} : memref<3x128xf32, #tpu.memory_space<vmem>>, vector<3x128xf32>,
    return
  }
  func.func @transform_0(%arg0: i32) -> (i32, i32) {
    %c0_i32 = arith.constant 0 : i32
    %c0_i32_0 = arith.constant 0 : i32
    return %c0_i32, %arg0 : i32, i32
  }
  func.func @transform_1(%arg0: i32) -> (i32, i32) {
    %c0_i32 = arith.constant 0 : i32
    %c0_i32_0 = arith.constant 0 : i32
    %c0_i32_1 = arith.constant 0 : i32
    return %c0_i32, %c0_i32_0 : i32, i32
  }
  func.func @transform_2(%arg0: i32) -> (i32, i32) {
    %c0_i32 = arith.constant 0 : i32
    %c0_i32_0 = arith.constant 0 : i32
    %c0_i32_1 = arith.constant 0 : i32
    return %c0_i32, %c0_i32_0 : i32, i32
  }
  func.func @transform_3(%arg0: i32) -> (i32, i32) {
    %c0_i32 = arith.constant 0 : i32
    %c0_i32_0 = arith.constant 0 : i32
    %c0_i32_1 = arith.constant 0 : i32
    return %c0_i32, %c0_i32_0 : i32, i32
  }
  func.func @transform_4(%arg0: i32) -> (i32, i32, i32) {
    %c0_i32 = arith.constant 0 : i32
    %c0_i32_0 = arith.constant 0 : i32
    %c0_i32_1 = arith.constant 0 : i32
    %c0_i32_2 = arith.constant 0 : i32
    return %c0_i32, %c0_i32_0, %c0_i32_1 : i32, i32, i32
  }
  func.func @transform_5(%arg0: i32) -> (i32, i32, i32) {
    %c0_i32 = arith.constant 0 : i32
    %c0_i32_0 = arith.constant 0 : i32
    %c0_i32_1 = arith.constant 0 : i32
    %c0_i32_2 = arith.constant 0 : i32
    return %c0_i32, %c0_i32_0, %c0_i32_1 : i32, i32, i32
  }
  func.func @transform_6(%arg0: i32) -> (i32, i32) {
    %c0_i32 = arith.constant 0 : i32
    %c0_i32_0 = arith.constant 0 : i32
    %c0_i32_1 = arith.constant 0 : i32
    return %c0_i32, %c0_i32_0 : i32, i32
  }
  func.func @transform_7(%arg0: i32) -> (i32, i32) {
    %c0_i32 = arith.constant 0 : i32
    %c0_i32_0 = arith.constant 0 : i32
    %c0_i32_1 = arith.constant 0 : i32
    return %c0_i32, %c0_i32_0 : i32, i32
  }
  func.func @transform_8(%arg0: i32) -> (i32, i32) {
    %c0_i32 = arith.constant 0 : i32
    %c0_i32_0 = arith.constant 0 : i32
    return %c0_i32, %arg0 : i32, i32
  }
}

</mosaic_0001>

<bundles_post_ra>
// kernel: tpu_custom_call.1
= control target key start
LH: loop header
LB: loop body
LE: loop exit
PB: predicated region body
PF: predicated region fallthrough
CT: control target
= control target key end

     0   :  { %13 = vsyncpa [#allocation3], 0  ;;  %s2084_s0 = inlined_call_operand.vmem [shape: f32[2,256], index: 0, kind: input, shape index: {}]   ;;  %s2085_s1 = inlined_call_operand.vmem [shape: f32[16,2], index: 1, kind: input, shape index: {}]   ;;  %s2086_s2 = inlined_call_operand.vmem [shape: bf16[32,32], index: 2, kind: input, shape index: {}]   ;;  %s2087_s3 = inlined_call_operand.vmem [shape: f32[32,1], index: 3, kind: input, shape index: {}]   ;;  %s2088_s4 = inlined_call_operand.vmem [shape: bf16[3,32,32], index: 4, kind: input, shape index: {}]   ;;  %s2089_s5 = inlined_call_operand.vmem [shape: f32[3,32,1], index: 5, kind: input, shape index: {}]   ;;  %s2090_s6 = inlined_call_operand.vmem [shape: bf16[3,32], index: 6, kind: input, shape index: {}]   ;;  %s2091_s7 = inlined_call_operand.vmem [shape: f32[3,1], index: 7, kind: input, shape index: {}]   ;;  %s2092_s8 = inlined_call_operand.hbm [shape: f32[3,256], index: 8, kind: output, shape index: {}]  }
   0x1   :  { %15 = vsyncpa [#allocation3 + $0x1], 0  ;;  %s1770_s27 = smov 0   ;;  %s1772_s28 = smov 0  }
   0x2   :  { %s1774_s29 = smov 0   ;;  %s1776_s30 = smov 0  }
   0x3 LB: > { %s1791_s9 = sadd.s32 4294967295, %s1713_s30   ;;  %s1436_s10 = sadd.s32 4294967294, %s1713_s30   ;;  %s1713_s30 = sphi %s1776_s30, %s2098_s30   ;;  %s1709_s29 = sphi %s1774_s29, %s2097_s29   ;;  %s1705_s28 = sphi %s1772_s28, %s2096_s28   ;;  %s1701_s27 = sphi %s1770_s27, %s2095_s27  }
   0x4   : > { %s1795_s11 = sadd.s32 1, %s1713_s30   ;;  %s201_s12 = sadd.s32 1, %s1709_s29 }
   0x5   : > { %s198_s13 = ssub.s32 %s1713_s30, %s1795_s11  ;;  %p211_p0 = scmp.ne.s32.totalorder %s1709_s29, %s1705_s28 }
   0x6   : > { %p199_p1 = scmp.eq.s32.totalorder %s198_s13, 0  ;;  %p212_p2 = scmp.eq.s32.totalorder %s1791_s9, 1 }
   0x7   : > { %p217_p3 = scmp.ne.s32.totalorder %s1705_s28, %s1701_s27  ;;  %p218_p4 = scmp.eq.s32.totalorder %s1436_s10, 1 }
   0x8   : > { %s1806_s14 = scalar_select %p199_p1, %s1709_s29, %s201_s12  }
   0x9   : > { %p1808_p5 = por %p212_p2, %p211_p0  ;;  %p1812_p6 = por %p218_p4, %p217_p3 }
   0xa   : > { %p1439_p7 = scmp.ge.s32.totalorder %s1713_s30, 1  ;;  %p264_p8 = scmp.lt.s32.totalorder %s1713_s30, 3 }
   0xc   : > { %p265_p9 = pnand %p1439_p7, %p264_p8 }
   0xd   : > { %p297_p10 = scmp.lt.s32.totalorder (!%p265_p9), %s1791_s9, 1  ;;  %v303_v0 = vld [vmem:[%s2085_s1] sm:$0xff] (!%p265_p9)  ;;  %vm305_vm0 = vcmask (!%p265_p9), 15360   ;;  %vm312_vm1 = vcmask (!%p265_p9), 1041408   ;;  %v304_v1 = vld [vmem:[%s2085_s1 + $0x8] sm:$0xff] (!%p265_p9)  ;;  %vm845_vm2 = vcmask (!%p265_p9), 261120  }
   0xe   : > { %268 = sbr.rel (%p265_p9) target bundleno = 1561 (0x619), region = 52  ;;  %1526 = vmatprep.mubr.msk.f32.mxu0 (!%p265_p9), %vm305_vm0, %v303_v0  ;;  %v1631_v3 = vld [vmem:[%s2086_s2] sm:$0xff] (!%p265_p9)   ;;  %v813_v5 = vld [vmem:[%s2087_s3 + $0x10] sm:$0xff] (!%p265_p9)  ;;  %v1715_v6 = vmov (!%p265_p9), 0   ;;  %v812_v7 = vld [vmem:[%s2087_s3 + $0x8] sm:$0xff] (!%p265_p9)  ;;  %s294_s26 = sand.u32 (!%p265_p9), 1, %s1705_s28  }
   0xf   : > { %1533 = vmatprep.mubr.msk.bf16.mxu1 (!%p265_p9), %vm845_vm2, %v1631_v3  ;;  %v811_v4 = vld [vmem:[%s2087_s3] sm:$0xff] (!%p265_p9)  ;;  %1629 = vset.pattern.permute.xlu0 (!%p265_p9), %v1715_v6  ;;  %v814_v8 = vld [vmem:[%s2087_s3 + $0x18] sm:$0xff] (!%p265_p9)  ;;  %v912_v10 = vld [vmem:[%s2089_s5 + $0x8] sm:$0xff] (!%p265_p9)  ;;  %v1716_v44 = vmov (!%p265_p9), 683565275   ;;  %s1440_s10 = sshll.u32 (!%p265_p9), %s294_s26, 2 }
  0x10   : > { %1630 = vset.pattern.permute.xlu1 (!%p265_p9), %v1715_v6  ;;  %817 = vperm.xlu0 (!%p265_p9), %1629, %v811_v4   ;;  %v911_v9 = vld [vmem:[%s2089_s5] sm:$0xff] (!%p265_p9)  ;;  %v913_v11 = vld [vmem:[%s2089_s5 + $0x10] sm:$0xff] (!%p265_p9)  ;;  %v914_v12 = vld [vmem:[%s2089_s5 + $0x18] sm:$0xff] (!%p265_p9)  ;;  %v1717_v48 = vmov (!%p265_p9), 2475754826   ;;  %s1499_s12 = sshll.u32 (!%p265_p9), %s1791_s9, 6 }
  0x11   : > { %827 = vperm.xlu1 (!%p265_p9), %1630, %v813_v5   ;;  %v1473_v13 = vld [vmem:[%s2089_s5 + $0x20] sm:$0xff] (!%p265_p9)  ;;  %v1474_v14 = vld [vmem:[%s2089_s5 + $0x28] sm:$0xff] (!%p265_p9)  ;;  %v1475_v15 = vld [vmem:[%s2089_s5 + $0x30] sm:$0xff] (!%p265_p9)  ;;  %v1718_v50 = vmov (!%p265_p9), 2131351028   ;;  %s296_s13 = scalar_lea.vmem (!%p265_p9), [#allocation2], %s1440_s10 }
  0x12   : > { %v1476_v16 = vld [vmem:[%s2089_s5 + $0x38] sm:$0xff] (!%p265_p9)  ;;  %v1485_v17 = vld [vmem:[%s2089_s5 + $0x40] sm:$0xff] (!%p265_p9)  ;;  %v1486_v18 = vld [vmem:[%s2089_s5 + $0x48] sm:$0xff] (!%p265_p9)  ;;  %v1719_v52 = vmov (!%p265_p9), 2102212464   ;;  %s1377_s17 = sshll.u32 (!%p265_p9), %s296_s13, 4  ;;  %s2044_s17 = int_to_ptr.vmem [resolvable:$true] %s1377_s17 }
  0x13   : > { %v1487_v23 = vld [vmem:[%s2089_s5 + $0x50] sm:$0xff] (!%p265_p9)  ;;  %v1488_v24 = vld [vmem:[%s2089_s5 + $0x58] sm:$0xff] (!%p265_p9)  ;;  %v1209_v31 = vld [vmem:[%s2091_s7] sm:$0x7] (!%p265_p9)  ;;  %v1720_v54 = vmov (!%p265_p9), 920167782  }
  0x14   : > { %822 = vperm.xlu0 (!%p265_p9), %1629, %v812_v7   ;;  %v1721_v61 = vmov (!%p265_p9), 1326507024   ;;  %s1651_s21 = scalar_lea.vmem (!%p265_p9), %s2044_s17, 64  ;;  %s1724_s22 = smov (!%p265_p9), [#allocation2]  }
  0x15   : > { %s298_s19 = scalar_select %p297_p10, %s1791_s9, 1  ;;  %832 = vperm.xlu1 %1630, %v814_v8  }
  0x16   : > { %s1364_s9 = scalar_lea.sflag [#allocation3], %s294_s26  ;;  %p1652_p11 = scmp.ne.s32.totalorder %s2044_s17, %s1651_s21 }
  0x17   : > { %s1441_s20 = sshll.u32 %s298_s19, 1  ;;  %s1655_s23 = sshll.u32 %s1724_s22, 4  ;;  %s1656_s23 = int_to_ptr.vmem [resolvable:$false] %s1655_s23 }
  0x18   : > { %s300_s25 = scalar_lea.vmem %s2084_s0, %s1441_s20  ;;  %917 = vperm.xlu0 %1629, %v911_v9   ;;  %s2042_s20 = scalar_lea.hbm %s2092_s8, %s1499_s12 }
  0x19   : > { %v302_v2 = vld [vmem:[%s300_s25] sm:$0x3]  ;;  %922 = vperm.xlu1 %1630, %v912_v10   ;;  %p1653_p12 = pnand %p1652_p11, %p1808_p5  ;;  %s1657_s24 = scalar_lea.vmem %s1656_s23, 128 }
  0x1a   : > { %1524 = vmatprep.subr.msk.mxu0 %vm312_vm1, %v302_v2  ;;  %p1658_p0 = scmp.lt.s32.totalorder %s2044_s17, %s1656_s23  ;;  %p1659_p1 = scmp.lt.s32.totalorder %s1657_s24, %s1651_s21 }
  0x1b   : > { %1525 = vmatpush3.msk.msra.mxu0 %vm312_vm1, %v302_v2  ;;  %p1654_p13 = pneg %p1653_p12 }
  0x1c   : > { %1527 = vmatmul.mubr.msk.f32.vlgmr.msra.gmra.mrb[0].mxu0 %vm305_vm0, %v304_v1  ;;  %927 = vperm.xlu0 %1629, %v913_v11   ;;  %p1660_p2 = por %p1659_p1, %p1658_p0 }
  0x1d   : > { %932 = vperm.xlu1 %1630, %v914_v12  }
  0x1e   : > { %p1661_p3 = pnand %p1660_p2, %p1654_p13 }
  0x20   : > { %1018 = vperm.xlu0 %1629, %v1473_v13  }
  0x21   : > { %1023 = vperm.xlu1 %1630, %v1474_v14  }
  0x24   : > { %1028 = vperm.xlu0 %1629, %v1475_v15  }
  0x25   : > { %1033 = vperm.xlu1 %1630, %v1476_v16  }
  0x28   : > { %1119 = vperm.xlu0 %1629, %v1485_v17  }
  0x29   : > { %1124 = vperm.xlu1 %1630, %v1486_v18  }
  0x2c   : > { %1129 = vperm.xlu0 %1629, %v1487_v23  }
  0x2d   : > { %1134 = vperm.xlu1 %1630, %v1488_v24  }
  0x30   : > { %1212 = vperm.xlu0 %1629, %v1209_v31  }
  0xef   : > { %v1875_v19 = vpop.f32.mrb[0].mxu0 }
  0xf0   : > { %v495_v20 = vand.u32 2147483647, %v1875_v19  ;;  %v498_v21 = vand.u32 2139095040, %v1875_v19  ;;  %v1879_v22 = vpop.f32.mrb[1].mxu0  ;;  %vm497_vm1 = vcmp.lt.s32.totalorder %v1875_v19, 0 }
  0xf1   : > { %v394_v25 = vand.u32 2139095040, %v1879_v22  ;;  %v391_v28 = vand.u32 2147483647, %v1879_v22 }
  0xf2   : > { %v499_v26 = vshrl.u32 %v498_v21, 23  ;;  %v502_v27 = vand.u32 8388607, %v495_v20 }
  0xf3   : > { %v395_v29 = vshrl.u32 %v394_v25, 23  ;;  %v1896_v35 = vand.u32 8388607, %v391_v28 }
  0xf4   : > { %v1449_v30 = vadd.s32 4294967169, %v499_v26  ;;  %v503_v34 = vor.u32 8388608, %v502_v27 }
  0xf5   : > { %v1445_v32 = vadd.s32 4294967169, %v395_v29  ;;  %v399_v42 = vor.u32 8388608, %v1896_v35 }
  0xf6   : > { %v505_v33 = vadd.s32 1, %v1449_v30  ;;  %v1898_v41 = vshll.u32 %v503_v34, 8 }
  0xf7   : > { %v401_v36 = vadd.s32 1, %v1445_v32 }
  0xf8   : > { %vm506_vm3 = vcmp.gt.s32.totalorder %v505_v33, 0 }
  0xf9   : > { %v507_v37 = vsel %vm506_vm3, %v505_v33, 0  ;;  %vm402_vm4 = vcmp.gt.s32.totalorder %v401_v36, 0  ;;  %vm496_vm3 = vcmp.le.f32.partialorder %v495_v20, 0.7853982 }
  0xfa   : > { %v508_v38 = vshrl.u32 %v507_v37, 5  ;;  %v509_v39 = vand.u32 31, %v507_v37  ;;  %v403_v40 = vsel %vm402_vm4, %v401_v36, 0  ;;  %v439_v36 = vshll.u32 %v399_v42, 8 }
  0xfb   : > { %v1902_v46 = vshrl.u32 %v403_v40, 5  ;;  %v405_v47 = vand.u32 31, %v403_v40  ;;  %vm393_vm4 = vcmp.lt.s32.totalorder %v1879_v22, 0 }
  0xfc   : > { %v510_v43 = vsub.s32 32, %v509_v39  ;;  %v512_v45 = vshll.u32 %v1716_v44, %v509_v39  ;;  %v515_v49 = vshll.u32 %v1717_v48, %v509_v39  ;;  %v518_v51 = vshll.u32 %v1718_v50, %v509_v39 }
  0xfd   : > { %v521_v53 = vshll.u32 %v1719_v52, %v509_v39  ;;  %v524_v55 = vshll.u32 %v1720_v54, %v509_v39  ;;  %vm527_vm5 = vcmp.lt.s32.totalorder %v508_v38, 1  ;;  %vm528_vm6 = vcmp.lt.s32.totalorder %v508_v38, 2 }
  0xfe   : > { %v513_v56 = vshrl.u32 %v1717_v48, %v510_v43  ;;  %v516_v57 = vshrl.u32 %v1718_v50, %v510_v43  ;;  %v519_v58 = vshrl.u32 %v1719_v52, %v510_v43  ;;  %v511_v59 = vshrl.u32 %v1716_v44, %v510_v43 }
  0xff   : > { %v522_v60 = vshrl.u32 %v1720_v54, %v510_v43  ;;  %v525_v62 = vshrl.u32 %v1721_v61, %v510_v43  ;;  %v406_v2 = vsub.s32 32, %v405_v47  ;;  %vm529_vm7 = vcmp.lt.s32.totalorder %v508_v38, 3 }
 0x100   : > { %v514_v63 = vor.u32 %v513_v56, %v512_v45  ;;  %v517_v0 = vor.u32 %v516_v57, %v515_v49  ;;  %v520_v1 = vor.u32 %v519_v58, %v518_v51  ;;  %vm530_vm8 = vcmp.lt.s32.totalorder %v508_v38, 4 }
 0x101   : > { %v523_v3 = vor.u32 %v522_v60, %v521_v53  ;;  %v526_v4 = vor.u32 %v525_v62, %v524_v55  ;;  %v408_v12 = vshll.u32 %v1716_v44, %v405_v47  ;;  %v409_v15 = vshrl.u32 %v1717_v48, %v406_v2 }
 0x102   : > { %v531_v5 = vsel %vm527_vm5, %v511_v59, %v514_v63  ;;  %v532_v6 = vsel %vm530_vm8, %v520_v1, 2102212464  ;;  %v535_v7 = vsel %vm527_vm5, %v514_v63, %v517_v0  ;;  %v539_v8 = vsel %vm527_vm5, %v517_v0, %v520_v1 }
 0x103   : > { %v533_v9 = vsel %vm529_vm7, %v517_v0, %v532_v6  ;;  %v536_v10 = vsel %vm530_vm8, %v523_v3, 920167782  ;;  %v540_v11 = vsel %vm530_vm8, %v526_v4, 1326507024  ;;  %v411_v16 = vshll.u32 %v1717_v48, %v405_v47 }
 0x104   : > { %v537_v13 = vsel %vm529_vm7, %v520_v1, %v536_v10  ;;  %v541_v14 = vsel %vm529_vm7, %v523_v3, %v540_v11  ;;  %v534_v17 = vsel %vm528_vm6, %v531_v5, %v533_v9  ;;  %v412_v23 = vshrl.u32 %v1718_v50, %v406_v2 }
 0x105   : > { %v538_v18 = vsel %vm528_vm6, %v535_v7, %v537_v13  ;;  %v542_v21 = vsel %vm528_vm6, %v539_v8, %v541_v14  ;;  %v410_v29 = vor.u32 %v409_v15, %v408_v12  ;;  %v414_v31 = vshll.u32 %v1718_v50, %v405_v47 }
 0x106   : > { %v1925_v24 = vmul.u32.u64.low %v1898_v41, %v542_v21  ;;  %v1926_v25 = vmul.u32.u64.high %v1898_v41, %v542_v21, %v1925_v24  ;;  %v1929_v26 = vmul.u32.u64.low %v1898_v41, %v538_v18  ;;  %v1930_v27 = vmul.u32.u64.high %v1898_v41, %v538_v18, %v1929_v26 }
 0x107   : > { %v413_v30 = vor.u32 %v412_v23, %v411_v16  ;;  %v415_v32 = vshrl.u32 %v1719_v52, %v406_v2  ;;  %v417_v33 = vshll.u32 %v1719_v52, %v405_v47  ;;  %v418_v34 = vshrl.u32 %v1720_v54, %v406_v2 }
 0x108   : > { %v421_v35 = vshrl.u32 %v1721_v61, %v406_v2  ;;  %v550_v37 = vmul.u32 %v1898_v41, %v534_v17  ;;  %v407_v38 = vshrl.u32 %v1716_v44, %v406_v2  ;;  %v420_v40 = vshll.u32 %v1720_v54, %v405_v47 }
 0x109   : > { %v416_v39 = vor.u32 %v415_v32, %v414_v31  ;;  %vm552_vm9 = vc.u32 %v1926_v25, %v1929_v26  ;;  %v553_v43 = vadd.s32 1, %v1930_v27  ;;  %v419_v45 = vor.u32 %v418_v34, %v417_v33 }
 0x10a   : > { %vm423_vm10 = vcmp.lt.s32.totalorder %v1902_v46, 1  ;;  %v422_v49 = vor.u32 %v421_v35, %v420_v40  ;;  %vm425_vm11 = vcmp.lt.s32.totalorder %v1902_v46, 3  ;;  %vm426_vm12 = vcmp.lt.s32.totalorder %v1902_v46, 4 }
 0x10b   : > { %v431_v42 = vsel %vm423_vm10, %v410_v29, %v413_v30  ;;  %v554_v41 = vsel %vm552_vm9, %v553_v43, %v1930_v27  ;;  %v428_v51 = vsel %vm426_vm12, %v416_v39, 2102212464  ;;  %v432_v53 = vsel %vm426_vm12, %v419_v45, 920167782 }
 0x10c   : > { %v435_v55 = vsel %vm423_vm10, %v413_v30, %v416_v39  ;;  %v555_v56 = vadd.s32 %v554_v41, %v550_v37  ;;  %vm424_vm13 = vcmp.lt.s32.totalorder %v1902_v46, 2  ;;  %v433_v47 = vsel %vm425_vm11, %v416_v39, %v432_v53 }
 0x10d   : > { %v436_v57 = vsel %vm426_vm12, %v422_v49, 1326507024  ;;  %v427_v58 = vsel %vm423_vm10, %v407_v38, %v410_v29  ;;  %v429_v59 = vsel %vm425_vm11, %v413_v30, %v428_v51  ;;  %v434_v60 = vsel %vm424_vm13, %v431_v42, %v433_v47 }
 0x10e   : > { %v437_v62 = vsel %vm425_vm11, %v419_v45, %v436_v57  ;;  %v556_v63 = vadd.s32 536870912, %v555_v56  ;;  %v1947_v1 = vmul.u32.u64.low %v439_v36, %v434_v60  ;;  %v1948_v2 = vmul.u32.u64.high %v439_v36, %v434_v60, %v1947_v1 }
 0x10f   : > { %v438_v0 = vsel %vm424_vm13, %v435_v55, %v437_v62  ;;  %v430_v6 = vsel %vm424_vm13, %v427_v58, %v429_v59  ;;  %v551_v27 = vadd.s32 %v1929_v26, %v1926_v25  ;;  %vm392_vm5 = vcmp.le.f32.partialorder %v391_v28, 0.7853982 }
 0x110   : > { %v1950_v3 = vmul.u32.u64.low %v439_v36, %v438_v0  ;;  %v1951_v4 = vmul.u32.u64.high %v439_v36, %v438_v0, %v1950_v3  ;;  %v557_v5 = vshrl.u32 %v556_v63, 30  ;;  %v449_v8 = vadd.s32 1, %v1948_v2 }
 0x111   : > { %v446_v46 = vmul.u32 %v439_v36, %v430_v6  ;;  %vm587_vm10 = vweird.f32 %v1875_v19 }
 0x112   : > { %v558_v7 = vshll.u32 %v557_v5, 30  ;;  %vm448_vm14 = vc.u32 %v1951_v4, %v1947_v1  ;;  %v447_v49 = vadd.s32 %v1947_v1, %v1951_v4  ;;  %v581_v58 = vsub.s32 4, %v557_v5 }
 0x113   : > { %v450_v10 = vsel %vm448_vm14, %v449_v8, %v1948_v2 }
 0x114   : > { %v559_v9 = vsub.s32 %v555_v56, %v558_v7  ;;  %v451_v11 = vadd.s32 %v450_v10, %v446_v46  ;;  %v582_v0 = vsel %vm497_vm1, %v581_v58, %v557_v5 }
 0x115   : > { %v584_v3 = vsel %vm496_vm3, 0, %v582_v0 }
 0x116   : > { %v561_v12 = vsub.s32 0, %v559_v9  ;;  %v452_v13 = vadd.s32 536870912, %v451_v11  ;;  %v588_v8 = vadd.s32 3, %v584_v3  ;;  %v795_v5 = vand.u32 3, %v584_v3  ;;  %v1634_v3 = vld [vmem:[%s2088_s4 + $0x8] sm:$0xff]  }
 0x118   : > { %v1450_v14 = vmin.u32 %v561_v12, %v559_v9  ;;  %v453_v15 = vshrl.u32 %v452_v13, 30  ;;  %v589_v12 = vand.u32 3, %v588_v8  ;;  %vm797_vm6 = vcmp.eq.s32.totalorder %v795_v5, 0 }
 0x119   : > { %vm800_vm7 = vcmp.eq.s32.totalorder %v795_v5, 2  ;;  %vm796_vm12 = vcmp.lt.s32.totalorder %v795_v5, 2 }
 0x11a   : > { %v563_v16 = vclz %v1450_v14  ;;  %v454_v17 = vshll.u32 %v453_v15, 30  ;;  %v477_v1 = vsub.s32 4, %v453_v15  ;;  %vm591_vm8 = vcmp.eq.s32.totalorder %v589_v12, 0 }
 0x11b   : > { %vm594_vm9 = vcmp.eq.s32.totalorder %v589_v12, 2  ;;  %vm590_vm11 = vcmp.lt.s32.totalorder %v589_v12, 2 }
 0x11c   : > { %v1451_v18 = vadd.s32 4294967294, %v563_v16  ;;  %v455_v21 = vsub.s32 %v451_v11, %v454_v17  ;;  %v478_v6 = vsel %vm393_vm4, %v477_v1, %v453_v15 }
 0x11d   : > { %v480_v46 = vsel %vm392_vm5, 0, %v478_v6 }
 0x11e   : > { %vm1452_vm15 = vcmp.lt.s32.totalorder %v1451_v18, 0  ;;  %v457_v24 = vsub.s32 0, %v455_v21  ;;  %v484_v11 = vadd.s32 3, %v480_v46  ;;  %v692_v28 = vand.u32 3, %v480_v46 }
 0x11f   : > { %v566_v23 = vsel %vm1452_vm15, 0, %v1451_v18 }
 0x120   : > { %v567_v29 = vsub.s32 32, %v566_v23  ;;  %v571_v30 = vsub.s32 4294967266, %v566_v23  ;;  %v1446_v31 = vmin.u32 %v457_v24, %v455_v21  ;;  %v568_v32 = vshll.u32 %v559_v9, %v566_v23 }
 0x121   : > { %v485_v15 = vand.u32 3, %v484_v11  ;;  %vm693_vm13 = vcmp.lt.s32.totalorder %v692_v28, 2  ;;  %vm694_vm15 = vcmp.eq.s32.totalorder %v692_v28, 0 }
 0x122   : > { %v569_v33 = vshrl.u32 %v551_v27, %v567_v29  ;;  %v572_v34 = vadd.s32 127, %v571_v30  ;;  %v459_v35 = vclz %v1446_v31 }
 0x123   : > { %vm490_vm14 = vcmp.eq.s32.totalorder %v485_v15, 2 }
 0x124   : > { %v570_v36 = vor.u32 %v569_v33, %v568_v32  ;;  %v573_v37 = vshll.u32 %v572_v34, 23  ;;  %v1447_v38 = vadd.s32 4294967294, %v459_v35 }
 0x126   : > { %v574_v39 = vor.u32 4788187, %v573_v37  ;;  %vm1448_vm0 = vcmp.lt.s32.totalorder %v1447_v38, 0  ;;  %v577_v43 = vcvt.s32.f32 %v570_v36 }
 0x127   : > { %v462_v45 = vsel %vm1448_vm0, 0, %v1447_v38  ;;  %vm697_vm0 = vcmp.eq.s32.totalorder %v692_v28, 2 }
 0x128   : > { %v575_v40 = vand.u32 2147483647, %v574_v39  ;;  %v463_v42 = vsub.s32 32, %v462_v45  ;;  %v467_v41 = vsub.s32 4294967266, %v462_v45  ;;  %v464_v26 = vshll.u32 %v455_v21, %v462_v45 }
 0x12a   : > { %v578_v25 = vmul.f32 %v577_v43, %v575_v40  ;;  %v465_v51 = vshrl.u32 %v447_v49, %v463_v42  ;;  %v468_v53 = vadd.s32 127, %v467_v41  ;;  %v1632_v42 = vld [vmem:[%s2086_s2 + $0x8] sm:$0xff]   ;;  %v818_v41 = vpop.permute.xlu0 %817 }
 0x12c   : > { %v579_v55 = vxor.u32 2147483648, %v578_v25  ;;  %v466_v56 = vor.u32 %v465_v51, %v464_v26  ;;  %v469_v47 = vshll.u32 %v468_v53, 23 }
 0x12e   : > { %v580_v57 = vsel %vm497_vm1, %v579_v55, %v578_v25  ;;  %v470_v60 = vor.u32 4788187, %v469_v47  ;;  %v473_v63 = vcvt.s32.f32 %v466_v56  ;;  %vm486_vm1 = vcmp.lt.s32.totalorder %v485_v15, 2  ;;  %v823_v47 = vpop.permute.xlu0 %822 }
 0x12f   : > { %v583_v59 = vsel %vm496_vm3, %v1875_v19, %v580_v57  ;;  %vm487_vm3 = vcmp.eq.s32.totalorder %v485_v15, 0  ;;  %v1633_v19 = vld [vmem:[%s2088_s4] sm:$0xff]  }
 0x130   : > { %1639 = vcosq.f32 %v583_v59  ;;  %v471_v62 = vand.u32 2147483647, %v470_v60  ;;  %1541 = vmatprep.mubr.msk.bf16.mxu0 %vm845_vm2, %v1633_v19 }
 0x131   : > { %1641 = vsinq.f32 %v583_v59 }
 0x132   : > { %v474_v2 = vmul.f32 %v473_v63, %v471_v62  ;;  %v918_v6 = vpop.permute.xlu0 %917 }
 0x134   : > { %v475_v4 = vxor.u32 2147483648, %v474_v2 }
 0x136   : > { %v476_v20 = vsel %vm393_vm4, %v475_v4, %v474_v2  ;;  %vm483_vm4 = vweird.f32 %v1879_v22  ;;  %v1635_v4 = vld [vmem:[%s2088_s4 + $0x10] sm:$0xff]  }
 0x137   : > { %v479_v7 = vsel %vm392_vm5, %v1879_v22, %v476_v20  ;;  %v828_v22 = vpop.permute.xlu1 %827  ;;  %vm1723_vm5 = vmmov 0  }
 0x138   : > { %1643 = vcosq.f32 %v479_v7 }
 0x139   : > { %1645 = vsinq.f32 %v479_v7  ;;  %v928_v7 = vpop.permute.xlu0 %927 }
 0x13a   : > { %v1640_v9 = vpop.eup %1639 }
 0x13b   : > { %v1642_v10 = vpop.eup %1641  ;;  %v595_v14 = vxor.u32 2147483648, %v1640_v9  ;;  %v833_v53 = vpop.permute.xlu1 %832 }
 0x13c   : > { %v592_v13 = vxor.u32 2147483648, %v1642_v10 }
 0x13d   : > { %v596_v17 = vsel %vm594_vm9, %v595_v14, %v1642_v10  ;;  %v802_v21 = vsel %vm800_vm7, %v595_v14, %v1642_v10 }
 0x13e   : > { %v593_v16 = vsel %vm591_vm8, %v1640_v9, %v592_v13  ;;  %v799_v18 = vsel %vm797_vm6, %v1640_v9, %v592_v13 }
 0x13f   : > { %v597_v29 = vsel %vm590_vm11, %v593_v16, %v596_v17  ;;  %v803_v30 = vsel %vm796_vm12, %v799_v18, %v802_v21  ;;  %v923_v20 = vpop.permute.xlu1 %922 }
 0x140   : > { %v598_v35 = vsel %vm587_vm10, nan, %v597_v29  ;;  %v804_v37 = vsel %vm587_vm10, nan, %v803_v30 }
 0x142   : > { %v1644_v23 = vpop.eup %1643 }
 0x143   : > { %v1646_v24 = vpop.eup %1645  ;;  %v491_v27 = vxor.u32 2147483648, %v1644_v23  ;;  %v933_v10 = vpop.permute.xlu1 %932 }
 0x144   : > { %v488_v31 = vxor.u32 2147483648, %v1646_v24 }
 0x145   : > { %v492_v32 = vsel %vm490_vm14, %v491_v27, %v1646_v24  ;;  %v699_v33 = vsel %vm697_vm0, %v491_v27, %v1646_v24  ;;  %v1637_v24 = vld [vmem:[%s2088_s4 + $0x20] sm:$0xff]   ;;  %v1019_v27 = vpop.permute.xlu0 %1018 }
 0x146   : > { %v489_v34 = vsel %vm487_vm3, %v1644_v23, %v488_v31  ;;  %v696_v36 = vsel %vm694_vm15, %v1644_v23, %v488_v31  ;;  %v1636_v23 = vld [vmem:[%s2088_s4 + $0x18] sm:$0xff]  }
 0x147   : > { %v493_v38 = vsel %vm486_vm1, %v489_v34, %v492_v32  ;;  %v700_v39 = vsel %vm693_vm13, %v696_v36, %v699_v33  ;;  %v1024_v29 = vpop.permute.xlu1 %1023 }
 0x148   : > { %v494_v40 = vsel %vm483_vm4, nan, %v493_v38  ;;  %v701_v43 = vsel %vm483_vm4, nan, %v700_v39 }
 0x149   : > { %v809_v45 = vpack.c.bf16 %v598_v35, %v494_v40  ;;  %v810_v49 = vpack.c.bf16 %v804_v37, %v701_v43  ;;  %v1029_v30 = vpop.permute.xlu0 %1028 }
 0x14b   : > { %1529 = vmatprep.subr.bf16.mxu1 %v809_v45  ;;  %v1034_v34 = vpop.permute.xlu1 %1033 }
 0x14c   : > { %1530 = vmatpush3.bf16.msra.mxu1 %v809_v45 }
 0x14d   : > { %1531 = vmatprep.subr.bf16.mxu1 %v810_v49 }
 0x150   : > { %1532 = vmatpush3.bf16.msra.mxu1 %v810_v49 }
 0x153   : > { %1534 = vmatmul.mubr.msk.bf16.vlgmr.msra.gmra.mrb[0].mxu1 %vm845_vm2, %v1632_v42 }
 0x154   : > { %1549 = vmatprep.mubr.msk.bf16.mxu1 %vm845_vm2, %v1635_v4 }
 0x226   : > { %v1535_v25 = vpop.f32.mrb[0].mxu1 }
 0x227   : > { %v895_v26 = vadd.f32 %v1535_v25, %v828_v22  ;;  %v886_v51 = vpop.f32.mrb[1].mxu1  ;;  %v1638_v22 = vld [vmem:[%s2088_s4 + $0x28] sm:$0xff]   ;;  %v1120_v25 = vpop.permute.xlu0 %1119 }
 0x228   : > { %v887_v55 = vadd.f32 %v886_v51, %v818_v41  ;;  %v1536_v56 = vpop.f32.mrb[2].mxu1  ;;  %v1722_v41 = vmov 0.0  }
 0x229   : > { %v898_v57 = vadd.f32 %v1536_v56, %v833_v53  ;;  %v889_v58 = vpop.f32.mrb[3].mxu1  ;;  %v903_v60 = vmax.f32 %v895_v26, 0.0  ;;  %v1125_v26 = vpop.permute.xlu1 %1124 }
 0x22a   : > { %v890_v59 = vadd.f32 %v889_v58, %v823_v47  ;;  %v901_v63 = vmax.f32 %v887_v55, 0.0 }
 0x22b   : > { %v904_v62 = vmax.f32 %v898_v57, 0.0  ;;  %v1130_v51 = vpop.permute.xlu0 %1129 }
 0x22c   : > { %v902_v0 = vmax.f32 %v890_v59, 0.0 }
 0x22d   : > { %v910_v1 = vpack.c.bf16 %v904_v62, %v903_v60  ;;  %v1135_v47 = vpop.permute.xlu1 %1134 }
 0x22e   : > { %v909_v2 = vpack.c.bf16 %v902_v0, %v901_v63 }
 0x230   : > { %1537 = vmatprep.subr.bf16.mxu0 %v909_v2 }
 0x231   : > { %1538 = vmatpush3.bf16.msra.mxu0 %v909_v2 }
 0x232   : > { %1539 = vmatprep.subr.bf16.mxu0 %v910_v1 }
 0x235   : > { %1540 = vmatpush3.bf16.msra.mxu0 %v910_v1 }
 0x238   : > { %1542 = vmatmul.mubr.msk.bf16.vlgmr.msra.gmra.mrb[4].mxu0 %vm845_vm2, %v1634_v3 }
 0x239   : > { %1557 = vmatprep.mubr.msk.bf16.mxu0 %vm845_vm2, %v1637_v24 }
 0x30b   : > { %v1543_v8 = vpop.f32.mrb[4].mxu0 }
 0x30c   : > { %v994_v46 = vadd.f32 %v1543_v8, %v928_v7  ;;  %v985_v9 = vpop.f32.mrb[5].mxu0 }
 0x30d   : > { %v986_v5 = vadd.f32 %v985_v9, %v918_v6  ;;  %v1544_v11 = vpop.f32.mrb[6].mxu0  ;;  %v1206_v6 = vld [vmem:[%s2090_s6] sm:$0x3] }
 0x30e   : > { %v997_v12 = vadd.f32 %v1544_v11, %v933_v10  ;;  %v988_v13 = vpop.f32.mrb[7].mxu0  ;;  %v1002_v15 = vmax.f32 %v994_v46, 0.0 }
 0x30f   : > { %v989_v14 = vadd.f32 %v988_v13, %v923_v20  ;;  %v1000_v16 = vmax.f32 %v986_v5, 0.0  ;;  %v1213_v20 = vpop.permute.xlu0 %1212 }
 0x310   : > { %v1003_v28 = vmax.f32 %v997_v12, 0.0 }
 0x311   : > { %v1001_v17 = vmax.f32 %v989_v14, 0.0 }
 0x312   : > { %v1010_v18 = vpack.c.bf16 %v1003_v28, %v1002_v15 }
 0x313   : > { %v1009_v21 = vpack.c.bf16 %v1001_v17, %v1000_v16 }
 0x315   : > { %1545 = vmatprep.subr.bf16.mxu1 %v1009_v21 }
 0x316   : > { %1546 = vmatpush3.bf16.msra.mxu1 %v1009_v21 }
 0x317   : > { %1547 = vmatprep.subr.bf16.mxu1 %v1010_v18 }
 0x31a   : > { %1548 = vmatpush3.bf16.msra.mxu1 %v1010_v18 }
 0x31b   : > { %1561 = vmatprep.subr.bf16.mxu1 %v1722_v41 }
 0x31d   : > { %1550 = vmatmul.mubr.msk.bf16.vlgmr.msra.gmra.mrb[4].mxu1 %vm845_vm2, %v1636_v23 }
 0x31e   : > { %1565 = vmatprep.mubr.msk.bf16.mxu1 %vm1723_vm5, %v1722_v41 }
 0x3f0   : > { %v1551_v31 = vpop.f32.mrb[4].mxu1 }
 0x3f1   : > { %v1095_v32 = vadd.f32 %v1551_v31, %v1029_v30  ;;  %v1086_v33 = vpop.f32.mrb[5].mxu1 }
 0x3f2   : > { %v1087_v35 = vadd.f32 %v1086_v33, %v1019_v27  ;;  %v1552_v36 = vpop.f32.mrb[6].mxu1 }
 0x3f3   : > { %v1098_v37 = vadd.f32 %v1552_v36, %v1034_v34  ;;  %v1089_v38 = vpop.f32.mrb[7].mxu1  ;;  %v1103_v40 = vmax.f32 %v1095_v32, 0.0 }
 0x3f4   : > { %v1090_v39 = vadd.f32 %v1089_v38, %v1024_v29  ;;  %v1101_v45 = vmax.f32 %v1087_v35, 0.0 }
 0x3f5   : > { %v1104_v43 = vmax.f32 %v1098_v37, 0.0 }
 0x3f6   : > { %v1102_v49 = vmax.f32 %v1090_v39, 0.0 }
 0x3f7   : > { %v1111_v42 = vpack.c.bf16 %v1104_v43, %v1103_v40 }
 0x3f8   : > { %v1110_v19 = vpack.c.bf16 %v1102_v49, %v1101_v45 }
 0x3fa   : > { %1553 = vmatprep.subr.bf16.mxu0 %v1110_v19 }
 0x3fb   : > { %1554 = vmatpush3.bf16.msra.mxu0 %v1110_v19 }
 0x3fc   : > { %1555 = vmatprep.subr.bf16.mxu0 %v1111_v42 }
 0x3ff   : > { %1556 = vmatpush3.bf16.msra.mxu0 %v1111_v42 }
 0x402   : > { %1558 = vmatmul.mubr.msk.bf16.vlgmr.msra.gmra.mrb[8].mxu0 %vm845_vm2, %v1638_v22 }
 0x4d5   : > { %v1559_v53 = vpop.f32.mrb[8].mxu0 }
 0x4d6   : > { %v1196_v55 = vadd.f32 %v1559_v53, %v1130_v51  ;;  %v1187_v56 = vpop.f32.mrb[9].mxu0 }
 0x4d7   : > { %v1188_v57 = vadd.f32 %v1187_v56, %v1120_v25  ;;  %v1560_v58 = vpop.f32.mrb[10].mxu0 }
 0x4d8   : > { %v1199_v59 = vadd.f32 %v1560_v58, %v1135_v47  ;;  %v1190_v60 = vpop.f32.mrb[11].mxu0  ;;  %v1204_v63 = vmax.f32 %v1196_v55, 0.0 }
 0x4d9   : > { %v1191_v62 = vadd.f32 %v1190_v60, %v1125_v26  ;;  %v1202_v1 = vmax.f32 %v1188_v57, 0.0 }
 0x4da   : > { %v1205_v0 = vmax.f32 %v1199_v59, 0.0 }
 0x4db   : > { %v1203_v2 = vmax.f32 %v1191_v62, 0.0 }
 0x4dc   : > { %v1208_v3 = vpack.c.bf16 %v1205_v0, %v1204_v63 }
 0x4dd   : > { %v1207_v4 = vpack.c.bf16 %v1203_v2, %v1202_v1 }
 0x4df   : > { %1562 = vmatpush3.bf16.msra.mxu1 %v1207_v4 }
 0x4e0   : > { %1563 = vmatprep.subr.bf16.mxu1 %v1722_v41 }
 0x4e3   : > { %1564 = vmatpush3.bf16.msra.mxu1 %v1208_v3 }
 0x4e6   : > { %1566 = vmatmul.mubr.msk.bf16.vlgmr.msra.gmra.mrb[8].mxu1 %vm845_vm2, %v1206_v6 }
 0x5b9   : > { %v1252_v7 = vpop.f32.mrb[8].mxu1 }
 0x5ba   : > { %v2005_v8 = vadd.f32 %v1252_v7, %v1213_v20  ;;  %v1567_v46 = vpop.f32.mrb[9].mxu1 }
 0x5bb   : > { %v1255_v9 = vpop.f32.mrb[10].mxu1 }
 0x5bc   : > { %v1261_v10 = vand.u32 2139095040, %v2005_v8  ;;  %v1568_v5 = vpop.f32.mrb[11].mxu1  ;;  %v1258_v14 = vand.u32 2147483647, %v2005_v8  ;;  %vm1260_vm12 = vcmp.lt.s32.totalorder %v2005_v8, 0  ;;  %vm1350_vm1 = vweird.f32 %v2005_v8 }
 0x5be   : > { %v1262_v11 = vshrl.u32 %v1261_v10, 23  ;;  %v1265_v16 = vand.u32 8388607, %v1258_v14  ;;  %vm1259_vm13 = vcmp.le.f32.partialorder %v1258_v14, 0.7853982 }
 0x5c0   : > { %v1494_v12 = vadd.s32 4294967169, %v1262_v11  ;;  %v1266_v35 = vor.u32 8388608, %v1265_v16 }
 0x5c2   : > { %v1268_v13 = vadd.s32 1, %v1494_v12 }
 0x5c4   : > { %vm1269_vm6 = vcmp.gt.s32.totalorder %v1268_v13, 0 }
 0x5c5   : > { %v1270_v15 = vsel %vm1269_vm6, %v1268_v13, 0 }
 0x5c6   : > { %v1272_v28 = vand.u32 31, %v1270_v15  ;;  %v1271_v18 = vshrl.u32 %v1270_v15, 5 }
 0x5c8   : > { %v1273_v17 = vsub.s32 32, %v1272_v28  ;;  %v1275_v21 = vshll.u32 %v1716_v44, %v1272_v28  ;;  %v1278_v23 = vshll.u32 %v1717_v48, %v1272_v28  ;;  %v1281_v29 = vshll.u32 %v1718_v50, %v1272_v28 }
 0x5c9   : > { %v1284_v31 = vshll.u32 %v1719_v52, %v1272_v28  ;;  %v1287_v33 = vshll.u32 %v1720_v54, %v1272_v28  ;;  %vm1290_vm2 = vcmp.lt.s32.totalorder %v1271_v18, 1  ;;  %vm1293_vm7 = vcmp.lt.s32.totalorder %v1271_v18, 4 }
 0x5ca   : > { %v1276_v24 = vshrl.u32 %v1717_v48, %v1273_v17  ;;  %v1279_v27 = vshrl.u32 %v1718_v50, %v1273_v17  ;;  %v1282_v30 = vshrl.u32 %v1719_v52, %v1273_v17  ;;  %v1285_v32 = vshrl.u32 %v1720_v54, %v1273_v17 }
 0x5cb   : > { %v1288_v34 = vshrl.u32 %v1721_v61, %v1273_v17  ;;  %v1274_v45 = vshrl.u32 %v1716_v44, %v1273_v17  ;;  %vm1292_vm8 = vcmp.lt.s32.totalorder %v1271_v18, 3  ;;  %vm1291_vm9 = vcmp.lt.s32.totalorder %v1271_v18, 2 }
 0x5cc   : > { %v1277_v36 = vor.u32 %v1276_v24, %v1275_v21  ;;  %v1280_v37 = vor.u32 %v1279_v27, %v1278_v23  ;;  %v1283_v38 = vor.u32 %v1282_v30, %v1281_v29  ;;  %v1286_v39 = vor.u32 %v1285_v32, %v1284_v31 }
 0x5cd   : > { %v1289_v48 = vor.u32 %v1288_v34, %v1287_v33  ;;  %v1306_v61 = vshll.u32 %v1266_v35, 8 }
 0x5ce   : > { %v1295_v40 = vsel %vm1293_vm7, %v1283_v38, 2102212464  ;;  %v1298_v50 = vsel %vm1290_vm2, %v1277_v36, %v1280_v37  ;;  %v1302_v43 = vsel %vm1290_vm2, %v1280_v37, %v1283_v38  ;;  %v1299_v52 = vsel %vm1293_vm7, %v1286_v39, 920167782 }
 0x5cf   : > { %v1303_v49 = vsel %vm1293_vm7, %v1289_v48, 1326507024  ;;  %v1300_v54 = vsel %vm1292_vm8, %v1283_v38, %v1299_v52  ;;  %v1294_v19 = vsel %vm1290_vm2, %v1274_v45, %v1277_v36  ;;  %v1296_v22 = vsel %vm1292_vm8, %v1280_v37, %v1295_v40 }
 0x5d0   : > { %v1304_v42 = vsel %vm1292_vm8, %v1286_v39, %v1303_v49  ;;  %v1301_v41 = vsel %vm1291_vm9, %v1298_v50, %v1300_v54  ;;  %v1297_v56 = vsel %vm1291_vm9, %v1294_v19, %v1296_v22 }
 0x5d1   : > { %v1305_v25 = vsel %vm1291_vm9, %v1302_v43, %v1304_v42  ;;  %v2025_v53 = vmul.u32.u64.low %v1306_v61, %v1301_v41  ;;  %v2026_v55 = vmul.u32.u64.high %v1306_v61, %v1301_v41, %v2025_v53  ;;  %v1313_v47 = vmul.u32 %v1306_v61, %v1297_v56 }
 0x5d2   : > { %v2022_v26 = vmul.u32.u64.low %v1306_v61, %v1305_v25  ;;  %v2023_v51 = vmul.u32.u64.high %v1306_v61, %v1305_v25, %v2022_v26 }
 0x5d3   : > { %v1316_v44 = vadd.s32 1, %v2026_v55 }
 0x5d4   : > { %vm1315_vm10 = vc.u32 %v2023_v51, %v2025_v53  ;;  %v1314_v6 = vadd.s32 %v2025_v53, %v2023_v51 }
 0x5d5   : > { %v1317_v57 = vsel %vm1315_vm10, %v1316_v44, %v2026_v55 }
 0x5d6   : > { %v1318_v58 = vadd.s32 %v1317_v57, %v1313_v47 }
 0x5d8   : > { %v1319_v59 = vadd.s32 536870912, %v1318_v58 }
 0x5da   : > { %v1320_v60 = vshrl.u32 %v1319_v59, 30 }
 0x5dc   : > { %v1321_v62 = vshll.u32 %v1320_v60, 30  ;;  %v1344_v16 = vsub.s32 4, %v1320_v60 }
 0x5de   : > { %v1322_v63 = vsub.s32 %v1318_v58, %v1321_v62  ;;  %v1345_v21 = vsel %vm1260_vm12, %v1344_v16, %v1320_v60 }
 0x5df   : > { %v1347_v24 = vsel %vm1259_vm13, 0, %v1345_v21 }
 0x5e0   : > { %v1324_v0 = vsub.s32 0, %v1322_v63  ;;  %v1351_v27 = vadd.s32 3, %v1347_v24 }
 0x5e2   : > { %v1495_v1 = vmin.u32 %v1324_v0, %v1322_v63  ;;  %v1352_v29 = vand.u32 3, %v1351_v27 }
 0x5e4   : > { %v1326_v2 = vclz %v1495_v1  ;;  %vm1357_vm14 = vcmp.eq.s32.totalorder %v1352_v29, 2  ;;  %vm1354_vm15 = vcmp.eq.s32.totalorder %v1352_v29, 0  ;;  %vm1353_vm0 = vcmp.lt.s32.totalorder %v1352_v29, 2 }
 0x5e6   : > { %v1496_v3 = vadd.s32 4294967294, %v1326_v2 }
 0x5e8   : > { %vm1497_vm11 = vcmp.lt.s32.totalorder %v1496_v3, 0 }
 0x5e9   : > { %v1329_v4 = vsel %vm1497_vm11, 0, %v1496_v3 }
 0x5ea   : > { %v1330_v20 = vsub.s32 32, %v1329_v4  ;;  %v1334_v7 = vsub.s32 4294967266, %v1329_v4  ;;  %v1331_v46 = vshll.u32 %v1322_v63, %v1329_v4 }
 0x5ec   : > { %v1332_v9 = vshrl.u32 %v1314_v6, %v1330_v20  ;;  %v1335_v10 = vadd.s32 127, %v1334_v7 }
 0x5ee   : > { %v1333_v5 = vor.u32 %v1332_v9, %v1331_v46  ;;  %v1336_v11 = vshll.u32 %v1335_v10, 23 }
 0x5f0   : > { %v1337_v12 = vor.u32 4788187, %v1336_v11  ;;  %v1340_v15 = vcvt.s32.f32 %v1333_v5 }
 0x5f2   : > { %v1338_v13 = vand.u32 2147483647, %v1337_v12 }
 0x5f4   : > { %v1341_v28 = vmul.f32 %v1340_v15, %v1338_v13 }
 0x5f6   : > { %v1342_v17 = vxor.u32 2147483648, %v1341_v28 }
 0x5f8   : > { %v1343_v18 = vsel %vm1260_vm12, %v1342_v17, %v1341_v28 }
 0x5f9   : > { %v1346_v23 = vsel %vm1259_vm13, %v2005_v8, %v1343_v18 }
 0x5fa   : > { %1647 = vcosq.f32 %v1346_v23 }
 0x5fb   : > { %1649 = vsinq.f32 %v1346_v23 }
 0x604   : > { %v1648_v30 = vpop.eup %1647 }
 0x605   : > { %v1650_v31 = vpop.eup %1649  ;;  %v1358_v32 = vxor.u32 2147483648, %v1648_v30 }
 0x606   : > { %v1355_v33 = vxor.u32 2147483648, %v1650_v31 }
 0x607   : > { %v1359_v14 = vsel %vm1357_vm14, %v1358_v32, %v1650_v31 }
 0x608   : > { %v1356_v34 = vsel %vm1354_vm15, %v1648_v30, %v1355_v33 }
 0x609   : > { %v1360_v35 = vsel %vm1353_vm0, %v1356_v34, %v1359_v14 }
 0x60a   : > { %v1361_v36 = vsel %vm1350_vm1, nan, %v1360_v35 }
 0x60b   : > { %1362 = vst [vmem:[%s296_s13] sm:$0x7] %v1361_v36 }
 0x60c   : > { %1664 = shalt.err (!%p1661_p3)
}
 0x60d   : > { %s1665_s25 = scalar_lea.hbm %s2042_s20, 64  ;;  %s1669_s12 = scalar_lea.hbm %s2092_s8, 128 }
 0x60e   : > { %p1666_p4 = scmp.ne.s32.totalorder %s2042_s20, %s1665_s25  ;;  %p1670_p9 = scmp.lt.u32.totalorder %s2042_s20, %s2092_s8 }
 0x60f   : > { %p1671_p10 = scmp.lt.u32.totalorder %s1669_s12, %s1665_s25  ;;  %p1673_p12 = scmp.lt.u32.totalorder %s1665_s25, %s2042_s20 }
 0x610   : > { %p1667_p7 = pnand %p1666_p4, %p1808_p5 }
 0x611   : > { %p1672_p11 = por %p1671_p10, %p1670_p9 }
 0x612   : > { %p1668_p8 = pneg %p1667_p7 }
 0x613   : > { %p1674_p13 = por %p1673_p12, %p1672_p11 }
 0x615   : > { %p1675_p0 = pnand %p1674_p13, %p1668_p8 }
 0x617   : > { %1678 = shalt.err (!%p1675_p0)
}
 0x618   : > { %1581 = dma.vmem_to_hbm [thread:$0]  (%p1808_p5), %s2044_s17, 64, %s2042_s20, %s1364_s9  }
 0x619 PF: > { %p1587_p1 = scmp.ge.s32.totalorder %s1713_s30, 2  ;;  %s1389_s19 = sand.u32 1, %s1701_s27  }
 0x61a   : > { %s1390_s21 = scalar_lea.sflag [#allocation3], %s1389_s19 }
 0x61b   : > { %p1584_p2 = pnand %p1587_p1, %p1812_p6 }
 0x61d   : > { %1696 = dma.done.wait (!%p1584_p2), %s1390_s21, 64  }
 0x61e   : > { %1698 = vsyncadd (!%p1584_p2), %s1390_s21, 4294967232  ;;  %p18_p3 = scmp.ge.s32.totalorder %s1795_s11, 4   ;;  %s2095_s27 = smov %s1705_s28 }
 0x61f   : > { %s2096_s28 = smov %s1709_s29  ;;  %s2097_s29 = smov %s1806_s14 }
 0x620   : > { %s2098_s30 = smov %s1795_s11  ;;  %20 = sbr.rel (!%p18_p3) target bundleno = 3 (0x3), region = 91 }
 0x627   :  { %1395 = vsyncpa [#allocation3], 1 }
 0x628   :  { %1397 = vsyncpa [#allocation3 + $0x1], 1 }

</bundles_post_ra>
